<compile_context>
chip_gen: v7x
topology: tpu7x:2x2x1
jax: 0.10.0
libtpu: 0.0.40
codegen_flags: <defaults>
</compile_context>

<pallas_src>
import functools

import jax
import jax.numpy as jnp
from jax.experimental import pallas as pl
from jax.experimental.pallas import tpu as pltpu

LANE = 128


# ----------------------------------------------------------------------------
# Helpers
# ----------------------------------------------------------------------------
def _round_up(v, m):
    return ((v + m - 1) // m) * m


def _vmem_capacity_bytes():
    """Per-core VMEM capacity; conservative fallback if the query fails."""
    try:
        return int(pltpu.get_tpu_info().vmem_capacity_bytes)
    except Exception:
        return 64 << 20  # v7x per-TC size: safe lower bound for all gens


def _vmem_limit(buffer_bytes, cap):
    """Scoped-VMEM limit: actual buffers + headroom, leaving >=16 MiB free."""
    need = buffer_bytes + (4 << 20)
    ceiling = max(cap - (16 << 20), 16 << 20)
    return int(min(max(need, 16 << 20), ceiling))


def _pad2d(a, rows, cols, dtype):
    """Zero-pad a 2-D array up to (rows, cols) and cast."""
    r, c = a.shape
    out = a.astype(dtype)
    if rows != r or cols != c:
        out = jnp.pad(out, ((0, rows - r), (0, cols - c)))
    return out


# ----------------------------------------------------------------------------
# Kernel 1: feature matmul  XW = X @ W   (row-tiled, bf16 in / bf16 out)
# ----------------------------------------------------------------------------
def _feat_matmul_kernel(x_ref, w_ref, out_ref):
    # x_ref:   [TM, F]  bf16 row tile of node features
    # w_ref:   [F, HP]  bf16 weight (lane-padded)
    # out_ref: [TM, HP] bf16
    out_ref[...] = jnp.dot(
        x_ref[...], w_ref[...], preferred_element_type=jnp.float32
    ).astype(out_ref.dtype)


def _feat_matmul(x_bf16, w_bf16, *, tm, vmem_cap):
    np_, f = x_bf16.shape
    hp = w_bf16.shape[1]
    bufs = 2 * (tm * f * 2 + f * hp * 2 + tm * hp * 2)  # double-buffered bf16
    return pl.pallas_call(
        _feat_matmul_kernel,
        out_shape=jax.ShapeDtypeStruct((np_, hp), jnp.bfloat16),
        grid=(np_ // tm,),
        in_specs=[
            pl.BlockSpec((tm, f), lambda i: (i, 0)),   # x row tile
            pl.BlockSpec((f, hp), lambda i: (0, 0)),   # W (grid-invariant)
        ],
        out_specs=pl.BlockSpec((tm, hp), lambda i: (i, 0)),
        compiler_params=pltpu.CompilerParams(
            dimension_semantics=("parallel",),
            vmem_limit_bytes=_vmem_limit(bufs, vmem_cap),
        ),
    )(x_bf16, w_bf16)


# ----------------------------------------------------------------------------
# Kernel 2: aggregation  out = act(adj @ XW + b)   (row x K tiled)
# ----------------------------------------------------------------------------
def _agg_kernel(adj_ref, xw_ref, b_ref, out_ref, acc_ref, *, apply_relu):
    # adj_ref: [TM, TK] bf16   row/K tile of normalized adjacency
    # xw_ref:  [TK, HP] bf16   K tile of the pre-computed feature matmul
    # b_ref:   [1,  HP] f32    bias (lane-padded)
    # out_ref: [TM, HP]        layer output row tile (bf16 for layer 1, f32 for layer 2)
    # acc_ref: [TM, HP] f32    VMEM accumulator across the K grid axis
    k = pl.program_id(1)

    @pl.when(k == 0)
    def _():
        acc_ref[...] = jnp.zeros_like(acc_ref)

    acc_ref[...] += jnp.dot(
        adj_ref[...], xw_ref[...], preferred_element_type=jnp.float32
    )

    @pl.when(k == pl.num_programs(1) - 1)
    def _():
        h = acc_ref[...] + b_ref[...]          # f32 epilogue (v5e: no bf16 VALU)
        if apply_relu:
            h = jnp.maximum(h, 0.0)
        out_ref[...] = h.astype(out_ref.dtype)


def _agg_plan_bytes(tm, tk, hp, out_bytes):
    return (
        2 * tm * tk * 2          # adj tile, bf16, double-buffered
        + 2 * tk * hp * 2        # XW tile, bf16, double-buffered
        + 2 * hp * 4             # bias, f32
        + 2 * tm * hp * out_bytes  # output tile
        + tm * hp * 4            # f32 accumulator scratch
    )


def _aggregate(adj_bf16, xw_bf16, b_f32, *, apply_relu, out_dtype, tm, vmem_cap):
    np_ = adj_bf16.shape[0]
    hp = xw_bf16.shape[1]
    out_bytes = jnp.dtype(out_dtype).itemsize

    # Single K block if it fits the VMEM budget, otherwise K-tile with TK = TM.
    budget = max(min(vmem_cap // 2, vmem_cap - (16 << 20)), 8 << 20)
    tk = np_
    if _agg_plan_bytes(tm, tk, hp, out_bytes) > budget:
        tk = tm
    nk = np_ // tk

    bufs = _agg_plan_bytes(tm, tk, hp, out_bytes)
    kernel = functools.partial(_agg_kernel, apply_relu=apply_relu)

    return pl.pallas_call(
        kernel,
        out_shape=jax.ShapeDtypeStruct((np_, hp), out_dtype),
        grid=(np_ // tm, nk),
        in_specs=[
            pl.BlockSpec((tm, tk), lambda i, k: (i, k)),  # adj row/K tile
            pl.BlockSpec((tk, hp), lambda i, k: (k, 0)),  # XW K tile
            pl.BlockSpec((1, hp), lambda i, k: (0, 0)),   # bias
        ],
        out_specs=pl.BlockSpec((tm, hp), lambda i, k: (i, 0)),
        scratch_shapes=[pltpu.VMEM((tm, hp), jnp.float32)],
        compiler_params=pltpu.CompilerParams(
            dimension_semantics=("parallel", "arbitrary"),
            vmem_limit_bytes=_vmem_limit(bufs, vmem_cap),
        ),
    )(adj_bf16, xw_bf16, b_f32)


# ----------------------------------------------------------------------------
# NodeEncoder forward (GCN branch, inference)
# ----------------------------------------------------------------------------
def node_encoder_gcn(x, adj, w1, b1, w2, b2):
    """relu(adj @ (x @ W1) + b1) -> adj @ (h1 @ W2) + b2 (dropout = identity)."""
    n, feat = x.shape
    hidden = w1.shape[1]
    out_dim = w2.shape[1]

    vmem_cap = _vmem_capacity_bytes()

    # Row tile: 256 (2-TC friendly, lane/sublane aligned) -> 512 for big graphs.
    tm = 512 if n > 4096 else 256
    np_ = _round_up(n, tm)            # zero-row-pad so the grid never degenerates

    # Lane-padded widths (multiples of 128 -> lane-dense stores / MXU columns).
    hp1 = _round_up(hidden, LANE)
    hp2 = _round_up(out_dim, LANE)

    # --- Parameters: pad + cast once in the wrapper ---------------------------
    w1_p = _pad2d(jnp.asarray(w1), feat, hp1, jnp.bfloat16)         # [F,   HP1]
    b1_p = _pad2d(jnp.asarray(b1).reshape(1, -1), 1, hp1, jnp.float32)
    # W2 rows padded to HP1 with zeros (they multiply h1's zero pad columns).
    w2_rows = jnp.zeros((hp1, out_dim), jnp.float32).at[:hidden, :].set(
        jnp.asarray(w2, jnp.float32))
    w2_p = _pad2d(w2_rows, hp1, hp2, jnp.bfloat16)                   # [HP1, HP2]
    b2_p = _pad2d(jnp.asarray(b2).reshape(1, -1), 1, hp2, jnp.float32)

    # --- Inputs: row-pad + cast to bf16 once (adj is reused by both layers) ---
    x_p = _pad2d(jnp.asarray(x), np_, feat, jnp.bfloat16)            # [NP, F]
    adj_p = _pad2d(jnp.asarray(adj), np_, np_, jnp.bfloat16)         # [NP, NP]

    # --- Layer 1: XW1 once, then aggregate + bias + ReLU (h1 stored bf16) -----
    xw1 = _feat_matmul(x_p, w1_p, tm=tm, vmem_cap=vmem_cap)          # [NP, HP1]
    h1 = _aggregate(adj_p, xw1, b1_p, apply_relu=True,
                    out_dtype=jnp.bfloat16, tm=tm, vmem_cap=vmem_cap)

    # Dropout: identity at inference.

    # --- Layer 2: XW2 once, then aggregate + bias (f32 output) ----------------
    xw2 = _feat_matmul(h1, w2_p, tm=tm, vmem_cap=vmem_cap)           # [NP, HP2]
    out_p = _aggregate(adj_p, xw2, b2_p, apply_relu=False,
                       out_dtype=jnp.float32, tm=tm, vmem_cap=vmem_cap)

    # Strip row / lane padding (small copy; keep the pad downstream if large).
    return out_p[:n, :out_dim]


def reference_gcn(x, adj, w1, b1, w2, b2):
    h1 = jnp.maximum(adj @ (x @ w1) + b1, 0.0)
    return adj @ (h1 @ w2) + b2


if __name__ == "__main__":
    # Small shapes consistent with the module's forward:
    #   N nodes, feat_projection_dim -> hidden_dim -> out_dim.
    N = 128
    FEAT = 32       # args.feat_projection_dim
    HIDDEN = 32     # args.hidden_dim
    OUT = 16        # args.out_dim

    key = jax.random.PRNGKey(0)
    kx, kadj, kw1, kb1, kw2, kb2 = jax.random.split(key, 6)

    x = jax.random.normal(kx, (N, FEAT), dtype=jnp.float32)

    # Symmetric Kipf-style normalized adjacency: D^-1/2 (A + I) D^-1/2.
    a = (jax.random.uniform(kadj, (N, N)) > 0.9).astype(jnp.float32)
    a = jnp.maximum(a, a.T) + jnp.eye(N, dtype=jnp.float32)
    d_inv_sqrt = 1.0 / jnp.sqrt(jnp.sum(a, axis=1))
    adj = a * d_inv_sqrt[:, None] * d_inv_sqrt[None, :]

    # Deterministic GraphConvolution parameters (uniform init like Kipf's GCN).
    def uniform_init(k, shape, fan):
        bound = 1.0 / jnp.sqrt(fan)
        return jax.random.uniform(k, shape, minval=-bound, maxval=bound,
                                  dtype=jnp.float32)

    w1 = uniform_init(kw1, (FEAT, HIDDEN), HIDDEN)
    b1 = uniform_init(kb1, (1, HIDDEN), HIDDEN)
    w2 = uniform_init(kw2, (HIDDEN, OUT), OUT)
    b2 = uniform_init(kb2, (1, OUT), OUT)

    out = node_encoder_gcn(x, adj, w1, b1, w2, b2)
    out = jax.block_until_ready(out)

    ref = reference_gcn(x, adj, w1, b1, w2, b2)
    assert out.shape == (N, OUT)
    # bf16 MXU operands (f32 accumulation) -> compare to f32 ref at bf16-level
    # tolerance.
    assert jnp.allclose(out, ref, atol=2e-2, rtol=2e-2)

    print("KERNEL_OK")
</pallas_src>

<mosaic_0001>
module attributes {stable_mosaic.version = 11 : i64} {
  func.func @_feat_matmul_kernel(%arg0: i32, %arg1: memref<256x32xbf16, #tpu.memory_space<vmem>>, %arg2: memref<32x128xbf16, #tpu.memory_space<vmem>>, %arg3: memref<256x128xbf16, #tpu.memory_space<vmem>>) attributes {dimension_semantics = [#tpu.dimension_semantics<parallel>], iteration_bounds = array<i64: 1>, scalar_prefetch = 0 : i64, scratch_operands = 0 : i64, tpu.core_type = #tpu.core_type<tc>, window_params = [{transform_indices = @transform_0, window_bounds = array<i64: 256, 32>}, {pipeline_mode = #tpu.pipeline_mode<synchronous>, transform_indices = @transform_1, window_bounds = array<i64: 32, 128>}, {transform_indices = @transform_2, window_bounds = array<i64: 256, 128>}]} {
    %c0 = arith.constant 0 : index
    %c0_0 = arith.constant 0 : index
    %0 = vector.load %arg1[%c0, %c0_0] : memref<256x32xbf16, #tpu.memory_space<vmem>>, vector<256x32xbf16>
    %c0_1 = arith.constant 0 : index
    %c0_2 = arith.constant 0 : index
    %1 = vector.load %arg2[%c0_1, %c0_2] : memref<32x128xbf16, #tpu.memory_space<vmem>>, vector<32x128xbf16>
    %cst = arith.constant dense<0.000000e+00> : vector<256x128xf32>
    %2 = tpu.matmul %0, %1, %cst {dimension_numbers = #tpu.dot_dimension_numbers<[1], [0], [0], [1], [0, 0, 1, 1], [], []>} : vector<256x32xbf16>, vector<32x128xbf16>, vector<256x128xf32> -> vector<256x128xf32>
    %3 = arith.truncf %2 : vector<256x128xf32> to vector<256x128xbf16>
    %c0_3 = arith.constant 0 : index
    %c0_4 = arith.constant 0 : index
    %4 = vector.load %arg3[%c0_3, %c0_4] : memref<256x128xbf16, #tpu.memory_space<vmem>>, vector<256x128xbf16>
    tpu.vector_store %arg3[%c0_3, %c0_4], %3 {strides = array<i32>} : memref<256x128xbf16, #tpu.memory_space<vmem>>, vector<256x128xbf16>,
    return
  }
  func.func @transform_0(%arg0: i32) -> (i32, i32) {
    %c0_i32 = arith.constant 0 : i32
    %c0_i32_0 = arith.constant 0 : i32
    return %arg0, %c0_i32 : i32, i32
  }
  func.func @transform_1(%arg0: i32) -> (i32, i32) {
    %c0_i32 = arith.constant 0 : i32
    %c0_i32_0 = arith.constant 0 : i32
    %c0_i32_1 = arith.constant 0 : i32
    return %c0_i32, %c0_i32_0 : i32, i32
  }
  func.func @transform_2(%arg0: i32) -> (i32, i32) {
    %c0_i32 = arith.constant 0 : i32
    %c0_i32_0 = arith.constant 0 : i32
    return %arg0, %c0_i32 : i32, i32
  }
}

</mosaic_0001>

<bundles_post_ra>
// kernel: tpu_custom_call.1
= control target key start
LH: loop header
LB: loop body
LE: loop exit
PB: predicated region body
PF: predicated region fallthrough
CT: control target
= control target key end

     0   :  { %vm141_vm0 = vcmask 261120   ;;  %s923_s0 = inlined_call_operand.vmem [shape: bf16[256,32], index: 0, kind: input, shape index: {}]   ;;  %s924_s1 = inlined_call_operand.vmem [shape: bf16[32,128], index: 1, kind: input, shape index: {}]   ;;  %s925_s2 = inlined_call_operand.hbm [shape: bf16[256,128], index: 2, kind: output, shape index: {}]  }
   0x1   :  { %v781_v0 = vld [vmem:[%s924_s1] sm:$0xff]   ;;  %v782_v1 = vld [vmem:[%s924_s1 + $0x8] sm:$0xff]   ;;  %v787_v6 = vld [vmem:[%s923_s0 + $0x10] sm:$0xff]  }
   0x2   :  { %738 = vmatprep.subr.bf16.mxu0 %v781_v0  ;;  %774 = vmatprep.subr.bf16.mxu1 %v781_v0  ;;  %v783_v2 = vld [vmem:[%s923_s0] sm:$0xff]   ;;  %v785_v4 = vld [vmem:[%s923_s0 + $0x8] sm:$0xff]   ;;  %v788_v7 = vld [vmem:[%s923_s0 + $0x50] sm:$0xff]  }
   0x3   :  { %739 = vmatpush3.bf16.msra.mxu0 %v781_v0  ;;  %776 = vmatpush3.bf16.msra.mxu1 %v781_v0  ;;  %v784_v3 = vld [vmem:[%s923_s0 + $0x40] sm:$0xff]   ;;  %v786_v5 = vld [vmem:[%s923_s0 + $0x48] sm:$0xff]   ;;  %v789_v8 = vld [vmem:[%s923_s0 + $0x18] sm:$0xff]  }
   0x4   :  { %740 = vmatprep.subr.bf16.mxu0 %v782_v1  ;;  %775 = vmatprep.subr.bf16.mxu1 %v782_v1  ;;  %v790_v9 = vld [vmem:[%s923_s0 + $0x58] sm:$0xff]   ;;  %v791_v10 = vld [vmem:[%s923_s0 + $0x20] sm:$0xff]  }
   0x5   :  { %742 = vmatprep.mubr.msk.bf16.mxu0 %vm141_vm0, %v783_v2  ;;  %758 = vmatprep.mubr.msk.bf16.mxu1 %vm141_vm0, %v784_v3  ;;  %v792_v11 = vld [vmem:[%s923_s0 + $0x60] sm:$0xff]  }
   0x7   :  { %741 = vmatpush3.bf16.msra.mxu0 %v782_v1  ;;  %777 = vmatpush3.bf16.msra.mxu1 %v782_v1 }
   0xa   :  { %743 = vmatmul.mubr.msk.bf16.vlgmr.msra.gmra.mrb[0].mxu0 %vm141_vm0, %v785_v4  ;;  %759 = vmatmul.mubr.msk.bf16.vlgmr.msra.gmra.mrb[0].mxu1 %vm141_vm0, %v786_v5 }
   0xb   :  { %746 = vmatprep.mubr.msk.bf16.mxu0 %vm141_vm0, %v787_v6  ;;  %762 = vmatprep.mubr.msk.bf16.mxu1 %vm141_vm0, %v788_v7 }
  0x12   :  { %747 = vmatmul.mubr.msk.bf16.gmra.mrb[4].mxu0 %vm141_vm0, %v789_v8  ;;  %763 = vmatmul.mubr.msk.bf16.gmra.mrb[4].mxu1 %vm141_vm0, %v790_v9 }
  0x13   :  { %7 = vsyncpa [#allocation3], 0  ;;  %750 = vmatprep.mubr.msk.bf16.mxu0 %vm141_vm0, %v791_v10  ;;  %766 = vmatprep.mubr.msk.bf16.mxu1 %vm141_vm0, %v792_v11  ;;  %v793_v12 = vld [vmem:[%s923_s0 + $0x28] sm:$0xff]   ;;  %v795_v14 = vld [vmem:[%s923_s0 + $0x30] sm:$0xff]  }
  0x14   :  { %v794_v13 = vld [vmem:[%s923_s0 + $0x68] sm:$0xff]   ;;  %v796_v15 = vld [vmem:[%s923_s0 + $0x70] sm:$0xff]   ;;  %v797_v16 = vld [vmem:[%s923_s0 + $0x38] sm:$0xff]  }
  0x15   :  { %v798_v17 = vld [vmem:[%s923_s0 + $0x78] sm:$0xff]   ;;  %s823_s0 = smov [#allocation2]  }
  0x16   :  { %s516_s16 = sshll.u32 %s823_s0, 4  ;;  %s517_s16 = int_to_ptr.vmem [resolvable:$true] %s516_s16 }
  0x17   :  { %s799_s17 = scalar_lea.vmem %s517_s16, 2048  ;;  %p804_p1 = scmp.lt.s32.totalorder %s517_s16, %s517_s16 }
  0x18   :  { %p800_p0 = scmp.ne.s32.totalorder %s517_s16, %s799_s17  ;;  %p805_p2 = scmp.lt.s32.totalorder %s799_s17, %s799_s17 }
  0x1a   :  { %751 = vmatmul.mubr.msk.bf16.gmra.mrb[8].mxu0 %vm141_vm0, %v793_v12  ;;  %767 = vmatmul.mubr.msk.bf16.gmra.mrb[8].mxu1 %vm141_vm0, %v794_v13  ;;  %p806_p3 = por %p805_p2, %p804_p1 }
  0x1b   :  { %754 = vmatprep.mubr.msk.bf16.mxu0 %vm141_vm0, %v795_v14  ;;  %770 = vmatprep.mubr.msk.bf16.mxu1 %vm141_vm0, %v796_v15 }
  0x1c   :  { %p807_p4 = pnand %p806_p3, %p800_p0 }
  0x22   :  { %755 = vmatmul.mubr.msk.bf16.gmra.mrb[12].mxu0 %vm141_vm0, %v797_v16  ;;  %771 = vmatmul.mubr.msk.bf16.gmra.mrb[12].mxu1 %vm141_vm0, %v798_v17 }
  0xdd   :  { %v744_v18 = vpop.f32.mrb[0].mxu0  ;;  %v760_v19 = vpop.f32.mrb[0].mxu1 }
  0xde   :  { %v224_v20 = vpop.f32.mrb[1].mxu0  ;;  %v288_v21 = vpop.f32.mrb[1].mxu1 }
  0xdf   :  { %v745_v22 = vpop.f32.mrb[2].mxu0  ;;  %v761_v23 = vpop.f32.mrb[2].mxu1 }
  0xe0   :  { %v633_v24 = vpack.c.bf16 %v745_v22, %v744_v18  ;;  %v673_v25 = vpack.c.bf16 %v761_v23, %v760_v19  ;;  %v227_v26 = vpop.f32.mrb[3].mxu0  ;;  %v291_v27 = vpop.f32.mrb[3].mxu1 }
  0xe1   :  { %v628_v28 = vpack.c.bf16 %v227_v26, %v224_v20  ;;  %v668_v29 = vpack.c.bf16 %v291_v27, %v288_v21 }
  0xe2   :  { %705 = vst [vmem:[#allocation2 + $0x8] sm:$0xff] %v633_v24   ;;  %713 = vst [vmem:[#allocation2 + $0x48] sm:$0xff] %v673_v25  }
  0xe3   :  { %629 = vst [vmem:[#allocation2] sm:$0xff] %v628_v28   ;;  %712 = vst [vmem:[#allocation2 + $0x40] sm:$0xff] %v668_v29  }
  0xe5   :  { %v748_v30 = vpop.f32.mrb[4].mxu0  ;;  %v764_v31 = vpop.f32.mrb[4].mxu1 }
  0xe6   :  { %v240_v32 = vpop.f32.mrb[5].mxu0  ;;  %v304_v33 = vpop.f32.mrb[5].mxu1 }
  0xe7   :  { %v749_v34 = vpop.f32.mrb[6].mxu0  ;;  %v765_v35 = vpop.f32.mrb[6].mxu1 }
  0xe8   :  { %v643_v36 = vpack.c.bf16 %v749_v34, %v748_v30  ;;  %v683_v37 = vpack.c.bf16 %v765_v35, %v764_v31  ;;  %v243_v38 = vpop.f32.mrb[7].mxu0  ;;  %v307_v39 = vpop.f32.mrb[7].mxu1 }
  0xe9   :  { %v638_v40 = vpack.c.bf16 %v243_v38, %v240_v32  ;;  %v678_v41 = vpack.c.bf16 %v307_v39, %v304_v33 }
  0xea   :  { %707 = vst [vmem:[#allocation2 + $0x18] sm:$0xff] %v643_v36   ;;  %715 = vst [vmem:[#allocation2 + $0x58] sm:$0xff] %v683_v37  }
  0xeb   :  { %706 = vst [vmem:[#allocation2 + $0x10] sm:$0xff] %v638_v40   ;;  %714 = vst [vmem:[#allocation2 + $0x50] sm:$0xff] %v678_v41  }
  0xed   :  { %v752_v42 = vpop.f32.mrb[8].mxu0  ;;  %v768_v43 = vpop.f32.mrb[8].mxu1 }
  0xee   :  { %v256_v44 = vpop.f32.mrb[9].mxu0  ;;  %v320_v45 = vpop.f32.mrb[9].mxu1 }
  0xef   :  { %v753_v46 = vpop.f32.mrb[10].mxu0  ;;  %v769_v47 = vpop.f32.mrb[10].mxu1 }
  0xf0   :  { %v653_v48 = vpack.c.bf16 %v753_v46, %v752_v42  ;;  %v693_v49 = vpack.c.bf16 %v769_v47, %v768_v43  ;;  %v259_v50 = vpop.f32.mrb[11].mxu0  ;;  %v323_v51 = vpop.f32.mrb[11].mxu1 }
  0xf1   :  { %v648_v52 = vpack.c.bf16 %v259_v50, %v256_v44  ;;  %v688_v53 = vpack.c.bf16 %v323_v51, %v320_v45 }
  0xf2   :  { %709 = vst [vmem:[#allocation2 + $0x28] sm:$0xff] %v653_v48   ;;  %717 = vst [vmem:[#allocation2 + $0x68] sm:$0xff] %v693_v49  }
  0xf3   :  { %708 = vst [vmem:[#allocation2 + $0x20] sm:$0xff] %v648_v52   ;;  %716 = vst [vmem:[#allocation2 + $0x60] sm:$0xff] %v688_v53  }
  0xf5   :  { %v756_v54 = vpop.f32.mrb[12].mxu0  ;;  %v772_v55 = vpop.f32.mrb[12].mxu1 }
  0xf6   :  { %v272_v56 = vpop.f32.mrb[13].mxu0  ;;  %v336_v57 = vpop.f32.mrb[13].mxu1 }
  0xf7   :  { %v757_v58 = vpop.f32.mrb[14].mxu0  ;;  %v773_v59 = vpop.f32.mrb[14].mxu1 }
  0xf8   :  { %v663_v60 = vpack.c.bf16 %v757_v58, %v756_v54  ;;  %v703_v61 = vpack.c.bf16 %v773_v59, %v772_v55  ;;  %v275_v62 = vpop.f32.mrb[15].mxu0  ;;  %v339_v63 = vpop.f32.mrb[15].mxu1 }
  0xf9   :  { %v658_v0 = vpack.c.bf16 %v275_v62, %v272_v56  ;;  %v698_v1 = vpack.c.bf16 %v339_v63, %v336_v57 }
  0xfa   :  { %711 = vst [vmem:[#allocation2 + $0x38] sm:$0xff] %v663_v60   ;;  %719 = vst [vmem:[#allocation2 + $0x78] sm:$0xff] %v703_v61  }
  0xfb   :  { %710 = vst [vmem:[#allocation2 + $0x30] sm:$0xff] %v658_v0   ;;  %718 = vst [vmem:[#allocation2 + $0x70] sm:$0xff] %v698_v1  }
  0xfc   :  { %810 = shalt.err (!%p807_p4)
}
  0xfd   :  { %s811_s19 = scalar_lea.hbm %s925_s2, 2048 }
  0xfe   :  { %p812_p5 = scmp.ne.s32.totalorder %s925_s2, %s811_s19  ;;  %p815_p6 = scmp.lt.u32.totalorder %s811_s19, %s925_s2 }
 0x100   :  { %p817_p7 = pnand %p815_p6, %p812_p5 }
 0x102   :  { %820 = shalt.err (!%p817_p7)
}
 0x103   :  { %s824_s24 = smov 64   ;;  %s825_s25 = smov 4  }
 0x104   :  { %522 = dma.vmem_to_hbm [thread:$0]  %s517_s16, 2048, %s925_s2, [#allocation3], %s824_s24, %s824_s24, %s825_s25  }
 0x105   :  { %821 = dma.done.wait [#allocation3], 2048  }
 0x106   :  { %822 = vsyncadd [#allocation3], 4294965248 }
 0x107   :  { %526 = vsyncpa [#allocation3], 1 }

</bundles_post_ra>
